<compile_context>
chip_gen: v5e
topology: v5e:2x2
jax: 0.10.0
libtpu: 0.0.40
codegen_flags: <defaults>
</compile_context>

<pallas_src>
import jax
import jax.numpy as jnp
from jax.experimental import pallas as pl
from jax.experimental.pallas import tpu as pltpu


def _round_up(x, m):
    return ((x + m - 1) // m) * m


def rnn_kernel(x_ref, wih_ref, whh_ref, b_ref, wfc_ref, bfc_ref, out_ref, xw_ref):
    """Single-invocation kernel: the whole (padded) problem is VMEM resident.

    x_ref   : (T, Bp, E)  time-major embedded input, batch padded to a sublane multiple
    wih_ref : (E, H)      W_ih^T
    whh_ref : (H, H)      W_hh^T
    b_ref   : (1, H)      b_ih + b_hh
    wfc_ref : (H, Op)     W_fc^T, output features padded to a lane multiple (128)
    bfc_ref : (1, Op)
    out_ref : (Bp, Op)
    xw_ref  : (T, Bp, H)  VMEM scratch holding the precomputed input projection
    """
    T, Bp, E = x_ref.shape
    H = whh_ref.shape[0]

    # ---- Phase 1: input projection hoisted out of the recurrence ----------------
    # One MXU-friendly (T*Bp, E) x (E, H) GEMM for all timesteps, RNN bias folded in.
    x_flat = x_ref[...].reshape(T * Bp, E)          # Bp is a multiple of 8 -> tile-exact
    xw = jnp.dot(x_flat, wih_ref[...], preferred_element_type=jnp.float32) + b_ref[...]
    xw_ref[...] = xw.reshape(T, Bp, H)

    # ---- Phase 2: serial recurrence — only tanh(xw_t + h @ W_hh) per step -------
    w_hh = whh_ref[...]                             # hoisted weight load

    def step(t, h):
        return jnp.tanh(
            xw_ref[t] + jnp.dot(h, w_hh, preferred_element_type=jnp.float32)
        )

    h_last = jax.lax.fori_loop(
        0, T, step, jnp.zeros((Bp, H), jnp.float32), unroll=True
    )

    # ---- Phase 3: fc(out[:, -1]) with a lane-dense (Op = k*128) store ------------
    out_ref[...] = (
        jnp.dot(h_last, wfc_ref[...], preferred_element_type=jnp.float32) + bfc_ref[...]
    ).astype(out_ref.dtype)


def rnn_forward(emb, w_ih, w_hh, b_rnn, w_fc, b_fc):
    """emb: (B, T, E) float32.  Returns (B, O) float32."""
    B, T, E = emb.shape
    H = w_hh.shape[0]
    O = w_fc.shape[1]

    Bp = _round_up(max(B, 8), 8)      # pad batch to a sublane multiple
    Op = _round_up(max(O, 128), 128)  # pad output features to a lane multiple

    # Layout plumbing in the wrapper (not compute): time-major + padding.
    x = jnp.transpose(emb, (1, 0, 2))                     # (T, B, E)
    x = jnp.pad(x, ((0, 0), (0, Bp - B), (0, 0)))         # (T, Bp, E)
    w_fc_p = jnp.pad(w_fc, ((0, 0), (0, Op - O)))         # (H, Op)
    b_fc_p = jnp.pad(b_fc, ((0, 0), (0, Op - O)))         # (1, Op)

    vmem = pl.BlockSpec(memory_space=pltpu.MemorySpace.VMEM)
    out = pl.pallas_call(
        rnn_kernel,
        out_shape=jax.ShapeDtypeStruct((Bp, Op), jnp.float32),
        in_specs=[vmem, vmem, vmem, vmem, vmem, vmem],
        out_specs=vmem,
        scratch_shapes=[pltpu.VMEM((T, Bp, H), jnp.float32)],  # precomputed x @ W_ih + b
    )(x, w_ih, w_hh, b_rnn, w_fc_p, b_fc_p)

    return out[:B, :O]


def make_params(key, vocab_size, emb_size, hidden_size, output_size, padding_idx):
    """Deterministic synthetic parameters mirroring the PyTorch module's shapes/init scheme."""
    ks = jax.random.split(key, 7)
    # Embedding ~ N(0,1), padding row zeroed (padding_idx behaviour)
    emb_table = jax.random.normal(ks[0], (vocab_size, emb_size), jnp.float32)
    emb_table = emb_table.at[padding_idx].set(0.0)
    # nn.RNN default init: U(-1/sqrt(H), 1/sqrt(H)); stored transposed here.
    s = 1.0 / jnp.sqrt(hidden_size)
    w_ih = jax.random.uniform(ks[1], (emb_size, hidden_size), jnp.float32, -s, s)
    w_hh = jax.random.uniform(ks[2], (hidden_size, hidden_size), jnp.float32, -s, s)
    b_ih = jax.random.uniform(ks[3], (hidden_size,), jnp.float32, -s, s)
    b_hh = jax.random.uniform(ks[4], (hidden_size,), jnp.float32, -s, s)
    b_rnn = (b_ih + b_hh).reshape(1, hidden_size)
    # nn.Linear default init: U(-1/sqrt(H), 1/sqrt(H)); stored transposed here.
    w_fc = jax.random.uniform(ks[5], (hidden_size, output_size), jnp.float32, -s, s)
    b_fc = jax.random.uniform(ks[6], (1, output_size), jnp.float32, -s, s)
    return emb_table, w_ih, w_hh, b_rnn, w_fc, b_fc


def rnn_module_forward(token_ids, params):
    emb_table, w_ih, w_hh, b_rnn, w_fc, b_fc = params
    # embedding lookup (glue, plain JAX gather)
    emb = jnp.take(emb_table, token_ids, axis=0)  # (B, T, E)
    return rnn_forward(emb, w_ih, w_hh, b_rnn, w_fc, b_fc)


def reference_forward(token_ids, params):
    """Pure-JAX reference of the same semantics, for a correctness check."""
    emb_table, w_ih, w_hh, b_rnn, w_fc, b_fc = params
    emb = jnp.take(emb_table, token_ids, axis=0)
    B, T, E = emb.shape
    H = w_hh.shape[0]
    h = jnp.zeros((B, H), jnp.float32)
    for t in range(T):
        h = jnp.tanh(emb[:, t, :] @ w_ih + h @ w_hh + b_rnn)
    return h @ w_fc + b_fc


if __name__ == "__main__":
    # Small shapes consistent with the module's forward.
    vocab_size, emb_size, padding_idx, output_size, hidden_size = 64, 32, 0, 4, 32
    batch, seq = 2, 8

    key = jax.random.PRNGKey(0)
    k_tok, k_par = jax.random.split(key)
    params = make_params(k_par, vocab_size, emb_size, hidden_size, output_size, padding_idx)

    # token ids (B, T); include some padding_idx tokens
    token_ids = jax.random.randint(k_tok, (batch, seq), 0, vocab_size, dtype=jnp.int32)

    out = rnn_module_forward(token_ids, params)
    out = jax.block_until_ready(out)

    ref = reference_forward(token_ids, params)
    assert out.shape == (batch, output_size)
    assert jnp.allclose(out, ref, atol=1e-4, rtol=1e-4), "mismatch vs JAX reference"

    print("KERNEL_OK")
</pallas_src>

<mosaic_0001>
module attributes {stable_mosaic.version = 11 : i64} {
  func.func @rnn_kernel(%arg0: memref<8x8x32xf32, #tpu.memory_space<vmem>>, %arg1: memref<32x32xf32, #tpu.memory_space<vmem>>, %arg2: memref<32x32xf32, #tpu.memory_space<vmem>>, %arg3: memref<1x32xf32, #tpu.memory_space<vmem>>, %arg4: memref<32x128xf32, #tpu.memory_space<vmem>>, %arg5: memref<1x128xf32, #tpu.memory_space<vmem>>, %arg6: memref<8x128xf32, #tpu.memory_space<vmem>>, %arg7: memref<8x8x32xf32, #tpu.memory_space<vmem>>) attributes {dimension_semantics = [], scalar_prefetch = 0 : i64, scratch_operands = 1 : i64, tpu.core_type = #tpu.core_type<tc>} {
    %c0 = arith.constant 0 : index
    %c0_0 = arith.constant 0 : index
    %c0_1 = arith.constant 0 : index
    %0 = vector.load %arg0[%c0, %c0_0, %c0_1] : memref<8x8x32xf32, #tpu.memory_space<vmem>>, vector<8x8x32xf32>
    %1 = vector.shape_cast %0 : vector<8x8x32xf32> to vector<64x32xf32>
    %c0_2 = arith.constant 0 : index
    %c0_3 = arith.constant 0 : index
    %2 = vector.load %arg1[%c0_2, %c0_3] : memref<32x32xf32, #tpu.memory_space<vmem>>, vector<32x32xf32>
    %cst = arith.constant dense<0.000000e+00> : vector<64x32xf32>
    %3 = tpu.matmul %1, %2, %cst {dimension_numbers = #tpu.dot_dimension_numbers<[1], [0], [0], [1], [0, 0, 1, 1], [], []>} : vector<64x32xf32>, vector<32x32xf32>, vector<64x32xf32> -> vector<64x32xf32>
    %c0_4 = arith.constant 0 : index
    %c0_5 = arith.constant 0 : index
    %4 = vector.load %arg3[%c0_4, %c0_5] : memref<1x32xf32, #tpu.memory_space<vmem>>, vector<1x32xf32>
    %5 = vector.broadcast %4 : vector<1x32xf32> to vector<64x32xf32>
    %6 = arith.addf %3, %5 : vector<64x32xf32>
    %7 = vector.shape_cast %6 : vector<64x32xf32> to vector<8x8x32xf32>
    %c0_6 = arith.constant 0 : index
    %c0_7 = arith.constant 0 : index
    %c0_8 = arith.constant 0 : index
    %8 = vector.load %arg7[%c0_6, %c0_7, %c0_8] : memref<8x8x32xf32, #tpu.memory_space<vmem>>, vector<8x8x32xf32>
    tpu.vector_store %arg7[%c0_6, %c0_7, %c0_8], %7 {strides = array<i32>} : memref<8x8x32xf32, #tpu.memory_space<vmem>>, vector<8x8x32xf32>,
    %c0_9 = arith.constant 0 : index
    %c0_10 = arith.constant 0 : index
    %9 = vector.load %arg2[%c0_9, %c0_10] : memref<32x32xf32, #tpu.memory_space<vmem>>, vector<32x32xf32>
    %cst_11 = arith.constant 0.000000e+00 : f32
    %10 = vector.broadcast %cst_11 : f32 to vector<8x32xf32>
    %c0_i32 = arith.constant 0 : i32
    %11 = arith.index_cast %c0_i32 : i32 to index
    %c0_12 = arith.constant 0 : index
    %c0_13 = arith.constant 0 : index
    %12 = vector.load %arg7[%11, %c0_12, %c0_13] : memref<8x8x32xf32, #tpu.memory_space<vmem>>, vector<1x8x32xf32>
    %13 = vector.shape_cast %12 : vector<1x8x32xf32> to vector<8x32xf32>
    %cst_14 = arith.constant dense<0.000000e+00> : vector<8x32xf32>
    %14 = tpu.matmul %10, %9, %cst_14 {dimension_numbers = #tpu.dot_dimension_numbers<[1], [0], [0], [1], [0, 0, 1, 1], [], []>} : vector<8x32xf32>, vector<32x32xf32>, vector<8x32xf32> -> vector<8x32xf32>
    %15 = arith.addf %13, %14 : vector<8x32xf32>
    %16 = math.tanh %15 : vector<8x32xf32>
    %c1_i32 = arith.constant 1 : i32
    %17 = arith.index_cast %c1_i32 : i32 to index
    %c0_15 = arith.constant 0 : index
    %c0_16 = arith.constant 0 : index
    %18 = vector.load %arg7[%17, %c0_15, %c0_16] : memref<8x8x32xf32, #tpu.memory_space<vmem>>, vector<1x8x32xf32>
    %19 = vector.shape_cast %18 : vector<1x8x32xf32> to vector<8x32xf32>
    %cst_17 = arith.constant dense<0.000000e+00> : vector<8x32xf32>
    %20 = tpu.matmul %16, %9, %cst_17 {dimension_numbers = #tpu.dot_dimension_numbers<[1], [0], [0], [1], [0, 0, 1, 1], [], []>} : vector<8x32xf32>, vector<32x32xf32>, vector<8x32xf32> -> vector<8x32xf32>
    %21 = arith.addf %19, %20 : vector<8x32xf32>
    %22 = math.tanh %21 : vector<8x32xf32>
    %c2_i32 = arith.constant 2 : i32
    %23 = arith.index_cast %c2_i32 : i32 to index
    %c0_18 = arith.constant 0 : index
    %c0_19 = arith.constant 0 : index
    %24 = vector.load %arg7[%23, %c0_18, %c0_19] : memref<8x8x32xf32, #tpu.memory_space<vmem>>, vector<1x8x32xf32>
    %25 = vector.shape_cast %24 : vector<1x8x32xf32> to vector<8x32xf32>
    %cst_20 = arith.constant dense<0.000000e+00> : vector<8x32xf32>
    %26 = tpu.matmul %22, %9, %cst_20 {dimension_numbers = #tpu.dot_dimension_numbers<[1], [0], [0], [1], [0, 0, 1, 1], [], []>} : vector<8x32xf32>, vector<32x32xf32>, vector<8x32xf32> -> vector<8x32xf32>
    %27 = arith.addf %25, %26 : vector<8x32xf32>
    %28 = math.tanh %27 : vector<8x32xf32>
    %c3_i32 = arith.constant 3 : i32
    %29 = arith.index_cast %c3_i32 : i32 to index
    %c0_21 = arith.constant 0 : index
    %c0_22 = arith.constant 0 : index
    %30 = vector.load %arg7[%29, %c0_21, %c0_22] : memref<8x8x32xf32, #tpu.memory_space<vmem>>, vector<1x8x32xf32>
    %31 = vector.shape_cast %30 : vector<1x8x32xf32> to vector<8x32xf32>
    %cst_23 = arith.constant dense<0.000000e+00> : vector<8x32xf32>
    %32 = tpu.matmul %28, %9, %cst_23 {dimension_numbers = #tpu.dot_dimension_numbers<[1], [0], [0], [1], [0, 0, 1, 1], [], []>} : vector<8x32xf32>, vector<32x32xf32>, vector<8x32xf32> -> vector<8x32xf32>
    %33 = arith.addf %31, %32 : vector<8x32xf32>
    %34 = math.tanh %33 : vector<8x32xf32>
    %c4_i32 = arith.constant 4 : i32
    %35 = arith.index_cast %c4_i32 : i32 to index
    %c0_24 = arith.constant 0 : index
    %c0_25 = arith.constant 0 : index
    %36 = vector.load %arg7[%35, %c0_24, %c0_25] : memref<8x8x32xf32, #tpu.memory_space<vmem>>, vector<1x8x32xf32>
    %37 = vector.shape_cast %36 : vector<1x8x32xf32> to vector<8x32xf32>
    %cst_26 = arith.constant dense<0.000000e+00> : vector<8x32xf32>
    %38 = tpu.matmul %34, %9, %cst_26 {dimension_numbers = #tpu.dot_dimension_numbers<[1], [0], [0], [1], [0, 0, 1, 1], [], []>} : vector<8x32xf32>, vector<32x32xf32>, vector<8x32xf32> -> vector<8x32xf32>
    %39 = arith.addf %37, %38 : vector<8x32xf32>
    %40 = math.tanh %39 : vector<8x32xf32>
    %c5_i32 = arith.constant 5 : i32
    %41 = arith.index_cast %c5_i32 : i32 to index
    %c0_27 = arith.constant 0 : index
    %c0_28 = arith.constant 0 : index
    %42 = vector.load %arg7[%41, %c0_27, %c0_28] : memref<8x8x32xf32, #tpu.memory_space<vmem>>, vector<1x8x32xf32>
    %43 = vector.shape_cast %42 : vector<1x8x32xf32> to vector<8x32xf32>
    %cst_29 = arith.constant dense<0.000000e+00> : vector<8x32xf32>
    %44 = tpu.matmul %40, %9, %cst_29 {dimension_numbers = #tpu.dot_dimension_numbers<[1], [0], [0], [1], [0, 0, 1, 1], [], []>} : vector<8x32xf32>, vector<32x32xf32>, vector<8x32xf32> -> vector<8x32xf32>
    %45 = arith.addf %43, %44 : vector<8x32xf32>
    %46 = math.tanh %45 : vector<8x32xf32>
    %c6_i32 = arith.constant 6 : i32
    %47 = arith.index_cast %c6_i32 : i32 to index
    %c0_30 = arith.constant 0 : index
    %c0_31 = arith.constant 0 : index
    %48 = vector.load %arg7[%47, %c0_30, %c0_31] : memref<8x8x32xf32, #tpu.memory_space<vmem>>, vector<1x8x32xf32>
    %49 = vector.shape_cast %48 : vector<1x8x32xf32> to vector<8x32xf32>
    %cst_32 = arith.constant dense<0.000000e+00> : vector<8x32xf32>
    %50 = tpu.matmul %46, %9, %cst_32 {dimension_numbers = #tpu.dot_dimension_numbers<[1], [0], [0], [1], [0, 0, 1, 1], [], []>} : vector<8x32xf32>, vector<32x32xf32>, vector<8x32xf32> -> vector<8x32xf32>
    %51 = arith.addf %49, %50 : vector<8x32xf32>
    %52 = math.tanh %51 : vector<8x32xf32>
    %c7_i32 = arith.constant 7 : i32
    %53 = arith.index_cast %c7_i32 : i32 to index
    %c0_33 = arith.constant 0 : index
    %c0_34 = arith.constant 0 : index
    %54 = vector.load %arg7[%53, %c0_33, %c0_34] : memref<8x8x32xf32, #tpu.memory_space<vmem>>, vector<1x8x32xf32>
    %55 = vector.shape_cast %54 : vector<1x8x32xf32> to vector<8x32xf32>
    %cst_35 = arith.constant dense<0.000000e+00> : vector<8x32xf32>
    %56 = tpu.matmul %52, %9, %cst_35 {dimension_numbers = #tpu.dot_dimension_numbers<[1], [0], [0], [1], [0, 0, 1, 1], [], []>} : vector<8x32xf32>, vector<32x32xf32>, vector<8x32xf32> -> vector<8x32xf32>
    %57 = arith.addf %55, %56 : vector<8x32xf32>
    %58 = math.tanh %57 : vector<8x32xf32>
    %c8_i32 = arith.constant 8 : i32
    %c0_36 = arith.constant 0 : index
    %c0_37 = arith.constant 0 : index
    %59 = vector.load %arg4[%c0_36, %c0_37] : memref<32x128xf32, #tpu.memory_space<vmem>>, vector<32x128xf32>
    %cst_38 = arith.constant dense<0.000000e+00> : vector<8x128xf32>
    %60 = tpu.matmul %58, %59, %cst_38 {dimension_numbers = #tpu.dot_dimension_numbers<[1], [0], [0], [1], [0, 0, 1, 1], [], []>} : vector<8x32xf32>, vector<32x128xf32>, vector<8x128xf32> -> vector<8x128xf32>
    %c0_39 = arith.constant 0 : index
    %c0_40 = arith.constant 0 : index
    %61 = vector.load %arg5[%c0_39, %c0_40] : memref<1x128xf32, #tpu.memory_space<vmem>>, vector<1x128xf32>
    %62 = vector.broadcast %61 : vector<1x128xf32> to vector<8x128xf32>
    %63 = arith.addf %60, %62 : vector<8x128xf32>
    %c0_41 = arith.constant 0 : index
    %c0_42 = arith.constant 0 : index
    %64 = vector.load %arg6[%c0_41, %c0_42] : memref<8x128xf32, #tpu.memory_space<vmem>>, vector<8x128xf32>
    tpu.vector_store %arg6[%c0_41, %c0_42], %63 {strides = array<i32>} : memref<8x128xf32, #tpu.memory_space<vmem>>, vector<8x128xf32>,
    return
  }
}

</mosaic_0001>

<bundles_post_ra>
// kernel: tpu_custom_call.1
= control target key start
LH: loop header
LB: loop body
LE: loop exit
PB: predicated region body
PF: predicated region fallthrough
CT: control target
= control target key end

     0   :  { %11 = vsyncpa [#allocation4], 0  ;;  %s723_s0 = inlined_call_operand.hbm [shape: f32[8,8,32], index: 0, kind: input, shape index: {}]   ;;  %s724_s1 = inlined_call_operand.hbm [shape: f32[32,32], index: 1, kind: input, shape index: {}]   ;;  %s725_s2 = inlined_call_operand.hbm [shape: f32[32,32], index: 2, kind: input, shape index: {}]   ;;  %s726_s3 = inlined_call_operand.vmem [shape: f32[1,32], index: 3, kind: input, shape index: {}]   ;;  %s727_s4 = inlined_call_operand.hbm [shape: f32[32,128], index: 4, kind: input, shape index: {}]   ;;  %s728_s5 = inlined_call_operand.vmem [shape: f32[1,128], index: 5, kind: input, shape index: {}]   ;;  %s729_s6 = inlined_call_operand.hbm [shape: f32[8,128], index: 6, kind: output, shape index: {}]  }
   0x1   :  { %12 = vsyncpa [#allocation7], 0 }
   0x2   :  { %13 = vsyncpa [#allocation10], 0 }
   0x3   :  { %14 = vsyncpa [#allocation5], 0  ;;  %s32_s23 = sshll.u32 %s724_s1, 4  ;;  %s625_s24 = smov [#allocation6]   ;;  %s33_s23 = int_to_ptr.hbm [resolvable:$true] %s32_s23 }
   0x4   :  { %s34_s25 = sshll.u32 %s625_s24, 4  ;;  %s19_s28 = sshll.u32 %s723_s0, 4  ;;  %s35_s25 = int_to_ptr.vmem [resolvable:$true] %s34_s25  ;;  %s20_s28 = int_to_ptr.hbm [resolvable:$true] %s19_s28 }
   0x5   :  { %s626_s29 = smov 128   ;;  %s627_s30 = smov 8  }
   0x6   :  { %40 = dma.hbm_to_vmem [thread:$0]  %s33_s23, 512, %s35_s25, [#allocation7], %s626_s29, %s626_s29, %s627_s30  }
   0x7   :  { %s628_s7 = smov [#allocation3]   ;;  %s45_s11 = sshll.u32 %s725_s2, 4  ;;  %s46_s11 = int_to_ptr.hbm [resolvable:$true] %s45_s11 }
   0x8   :  { %s21_s8 = sshll.u32 %s628_s7, 4  ;;  %s60_s13 = sshll.u32 %s727_s4, 4  ;;  %s22_s8 = int_to_ptr.vmem [resolvable:$true] %s21_s8  ;;  %s61_s13 = int_to_ptr.hbm [resolvable:$true] %s60_s13 }
   0x9   :  { %27 = dma.hbm_to_vmem [thread:$0]  %s20_s28, 1024, %s22_s8, [#allocation4], %s626_s29, %s626_s29, %s627_s30  }
   0xa   :  { %s629_s14 = smov [#allocation8]   ;;  %s630_s0 = smov [#allocation9]  }
   0xb   :  { %s47_s15 = sshll.u32 %s629_s14, 4  ;;  %s62_s16 = sshll.u32 %s630_s0, 4  ;;  %s48_s15 = int_to_ptr.vmem [resolvable:$true] %s47_s15  ;;  %s63_s16 = int_to_ptr.vmem [resolvable:$true] %s62_s16 }
   0xc   :  { %53 = dma.hbm_to_vmem [thread:$0]  %s46_s11, 512, %s48_s15, [#allocation7], %s626_s29, %s626_s29, %s627_s30  }
   0xd   :  { %68 = dma.hbm_to_vmem [thread:$0]  %s61_s13, 512, %s63_s16, [#allocation10], %s626_s29, %s626_s29, %s627_s30  }
   0xe   :  { %617 = dma.done.wait [#allocation4], 1024  }
   0xf   :  { %618 = vsyncadd [#allocation4], 4294966272 }
  0x10   :  { %619 = dma.done.wait [#allocation7], 1024  }
  0x11   :  { %620 = vsyncadd [#allocation7], 4294966272 }
  0x12   :  { %621 = dma.done.wait [#allocation10], 512  }
  0x13   :  { %622 = vsyncadd [#allocation10], 4294966784  ;;  %v98_v0 = vld [vmem:[#allocation6 + $0x18] sm:$0xff]  ;;  %v97_v1 = vld [vmem:[#allocation6 + $0x10] sm:$0xff]  ;;  %vm103_vm0 = vcmask 261120   ;;  %v631_v10 = vmov 0.0  }
  0x14   :  { %140 = vmatpush.msra.mxu0 %v98_v0  ;;  %463 = vmatpush.msra.mxu1 %v98_v0  ;;  %v96_v2 = vld [vmem:[#allocation6 + $0x8] sm:$0xff]  ;;  %v680_v3 = vld [vmem:[#allocation8 + $0x18] sm:$0xff]  ;;  %v95_v4 = vld [vmem:[#allocation6] sm:$0xff]  ;;  %s632_s18 = smov [#allocation11]   ;;  %s435_s22 = sshll.u32 %s729_s6, 4  ;;  %s436_s22 = int_to_ptr.hbm [resolvable:$true] %s435_s22 }
  0x15   :  { %464 = vmatpush.msra.mxu2 %v98_v0  ;;  %251 = vmatpush.msra.mxu3 %v680_v3  ;;  %v87_v5 = vld [vmem:[#allocation3] sm:$0xff]  ;;  %v92_v6 = vld [vmem:[#allocation3 + $0x28] sm:$0xff]  ;;  %v179_v7 = vld [vmem:[#allocation8 + $0x10] sm:$0xff]  ;;  %s433_s19 = sshll.u32 %s632_s18, 4  ;;  %s434_s19 = int_to_ptr.vmem [resolvable:$true] %s433_s19 }
  0x16   :  { %141 = vmatpush.msra.mxu0 %v97_v1  ;;  %465 = vmatpush.msra.mxu1 %v97_v1  ;;  %v178_v8 = vld [vmem:[#allocation8 + $0x8] sm:$0xff]  ;;  %v177_v9 = vld [vmem:[#allocation8] sm:$0xff]  ;;  %v93_v11 = vld [vmem:[#allocation3 + $0x30] sm:$0xff] }
  0x17   :  { %466 = vmatpush.msra.mxu2 %v97_v1  ;;  %252 = vmatpush.msra.mxu3 %v179_v7  ;;  %v94_v12 = vld [vmem:[#allocation3 + $0x38] sm:$0xff]  ;;  %v88_v13 = vld [vmem:[#allocation3 + $0x8] sm:$0xff]  ;;  %v479_v14 = vld [vmem:[%s726_s3] ss:$0 sm:$0xff] }
  0x18   :  { %142 = vmatpush.msra.mxu0 %v96_v2  ;;  %467 = vmatpush.msra.mxu1 %v96_v2  ;;  %v89_v29 = vld [vmem:[#allocation3 + $0x10] sm:$0xff]  ;;  %v90_v34 = vld [vmem:[#allocation3 + $0x18] sm:$0xff]  ;;  %v91_v43 = vld [vmem:[#allocation3 + $0x20] sm:$0xff] }
  0x19   :  { %468 = vmatpush.msra.mxu2 %v96_v2  ;;  %253 = vmatpush.msra.mxu3 %v178_v8  ;;  %v399_v62 = vld [vmem:[#allocation9 + $0x18] sm:$0xff]  ;;  %v398_v63 = vld [vmem:[#allocation9 + $0x10] sm:$0xff]  ;;  %v397_v0 = vld [vmem:[#allocation9 + $0x8] sm:$0xff] }
  0x1a   :  { %143 = vmatpush.msra.mxu0 %v95_v4  ;;  %469 = vmatpush.msra.mxu1 %v95_v4  ;;  %v396_v1 = vld [vmem:[#allocation9] sm:$0xff] }
  0x1b   :  { %447 = vmatmul.msk.f32.vlgmr.msra.gmra.mxu0 %vm103_vm0, %v87_v5  ;;  %452 = vmatmul.msk.f32.vlgmr.msra.gmra.mxu1 %vm103_vm0, %v92_v6  ;;  %v480_v6 = vld [vmem:[%s728_s5] ss:$0 sm:$0xff] }
  0x1c   :  { %197 = vmatpush.msrb.mxu1 %v680_v3  ;;  %470 = vmatpush.msra.mxu2 %v95_v4 }
  0x1d   :  { %254 = vmatpush.msra.mxu3 %v177_v9  ;;  %453 = vmatmul.msk.f32.vlgmr.msra.gmra.mxu2 %vm103_vm0, %v93_v11 }
  0x1e   :  { %224 = vmatpush.msrb.mxu2 %v680_v3  ;;  %198 = vmatpush.msrb.mxu1 %v179_v7 }
  0x1f   :  { %332 = vmatpush.msrb.mxu3 %v680_v3 }
  0x20   :  { %225 = vmatpush.msrb.mxu2 %v179_v7  ;;  %199 = vmatpush.msrb.mxu1 %v178_v8 }
  0x21   :  { %333 = vmatpush.msrb.mxu3 %v179_v7 }
  0x22   :  { %226 = vmatpush.msrb.mxu2 %v178_v8  ;;  %200 = vmatpush.msrb.mxu1 %v177_v9 }
  0x23   :  { %201 = vmatmul.f32.vlgmr.msrb.gmra.mxu1 %v631_v10  ;;  %334 = vmatpush.msrb.mxu3 %v178_v8 }
  0x24   :  { %227 = vmatpush.msrb.mxu2 %v177_v9  ;;  %278 = vmatpush.msra.mxu1 %v680_v3 }
  0x25   :  { %335 = vmatpush.msrb.mxu3 %v177_v9  ;;  %454 = vmatmul.msk.f32.gmra.mxu2 %vm103_vm0, %v94_v12 }
  0x26   :  { %279 = vmatpush.msra.mxu1 %v179_v7  ;;  %305 = vmatpush.msra.mxu2 %v680_v3 }
  0x27   :  { %448 = vmatmul.msk.f32.gmra.mxu0 %vm103_vm0, %v88_v13 }
  0x28   :  { %280 = vmatpush.msra.mxu1 %v178_v8  ;;  %306 = vmatpush.msra.mxu2 %v179_v7 }
  0x2a   :  { %281 = vmatpush.msra.mxu1 %v177_v9  ;;  %307 = vmatpush.msra.mxu2 %v178_v8 }
  0x2c   :  { %359 = vmatpush.msrb.mxu1 %v680_v3  ;;  %308 = vmatpush.msra.mxu2 %v177_v9 }
  0x2e   :  { %360 = vmatpush.msrb.mxu1 %v179_v7 }
  0x2f   :  { %449 = vmatmul.msk.f32.gmra.mxu0 %vm103_vm0, %v89_v29 }
  0x30   :  { %361 = vmatpush.msrb.mxu1 %v178_v8 }
  0x32   :  { %362 = vmatpush.msrb.mxu1 %v177_v9 }
  0x37   :  { %450 = vmatmul.msk.f32.gmra.mxu0 %vm103_vm0, %v90_v34 }
  0x3f   :  { %451 = vmatmul.msk.f32.gmra.mxu0 %vm103_vm0, %v91_v43 }
  0x98   :  { %v145_v15 = vpop.f32.mrf.mxu0  ;;  %v160_v16 = vpop.f32.mrf.mxu1 }
  0x99   :  { %v146_v17 = vadd.f32 %v479_v14, %v145_v15  ;;  %v161_v18 = vadd.f32 %v479_v14, %v160_v16 }
  0x9b   :  { %169 = vst.msk [vmem:[#allocation2] sm:$0xff] %vm103_vm0, %v146_v17 }
  0x9c   :  { %174 = vst.msk [vmem:[#allocation2 + $0x28] sm:$0xff] %vm103_vm0, %v161_v18 }
  0xa0   :  { %v202_v19 = vpop.f32.mrf.mxu1  ;;  %v163_v23 = vpop.f32.mrf.mxu2 }
  0xa1   :  { %v164_v24 = vadd.f32 %v479_v14, %v163_v23 }
  0xa2   :  { %v181_v20 = vld [vmem:[#allocation2] sm:$0xff] }
  0xa3   :  { %v205_v21 = vadd.f32 %v202_v19, %v181_v20  ;;  %175 = vst.msk [vmem:[#allocation2 + $0x30] sm:$0xff] %vm103_vm0, %v164_v24  ;;  %v316_v54 = vld [vmem:[#allocation2 + $0x28] sm:$0xff] }
  0xa4   :  { %v148_v25 = vpop.f32.mrf.mxu0 }
  0xa5   :  { %481 = vtanh.f32 %v205_v21  ;;  %v149_v26 = vadd.f32 %v479_v14, %v148_v25 }
  0xa7   :  { %170 = vst.msk [vmem:[#allocation2 + $0x8] sm:$0xff] %vm103_vm0, %v149_v26 }
  0xa8   :  { %v166_v27 = vpop.f32.mrf.mxu2 }
  0xa9   :  { %v167_v28 = vadd.f32 %v479_v14, %v166_v27 }
  0xaa   :  { %v343_v58 = vld [vmem:[#allocation2 + $0x30] sm:$0xff] }
  0xab   :  { %v482_v22 = vpop.eup %481  ;;  %176 = vst.msk [vmem:[#allocation2 + $0x38] sm:$0xff] %vm103_vm0, %v167_v28 }
  0xac   :  { %455 = vmatmul.msk.f32.vlgmr.msrb.gmra.mxu2 %vm103_vm0, %v482_v22  ;;  %v151_v35 = vpop.f32.mrf.mxu0 }
  0xad   :  { %386 = vmatpush.msrb.mxu2 %v680_v3  ;;  %v152_v36 = vadd.f32 %v479_v14, %v151_v35 }
  0xae   :  { %v208_v30 = vld [vmem:[#allocation2 + $0x8] sm:$0xff] }
  0xaf   :  { %387 = vmatpush.msrb.mxu2 %v179_v7  ;;  %171 = vst.msk [vmem:[#allocation2 + $0x10] sm:$0xff] %vm103_vm0, %v152_v36 }
  0xb1   :  { %388 = vmatpush.msrb.mxu2 %v178_v8 }
  0xb2   :  { %v370_v2 = vld [vmem:[#allocation2 + $0x38] sm:$0xff] }
  0xb3   :  { %389 = vmatpush.msrb.mxu2 %v177_v9 }
  0xb4   :  { %v154_v41 = vpop.f32.mrf.mxu0 }
  0xb5   :  { %v155_v42 = vadd.f32 %v479_v14, %v154_v41 }
  0xb6   :  { %v235_v37 = vld [vmem:[#allocation2 + $0x10] sm:$0xff] }
  0xb7   :  { %172 = vst.msk [vmem:[#allocation2 + $0x18] sm:$0xff] %vm103_vm0, %v155_v42 }
  0xbc   :  { %v157_v48 = vpop.f32.mrf.mxu0 }
  0xbd   :  { %v158_v49 = vadd.f32 %v479_v14, %v157_v48 }
  0xbe   :  { %v262_v44 = vld [vmem:[#allocation2 + $0x18] sm:$0xff] }
  0xbf   :  { %173 = vst.msk [vmem:[#allocation2 + $0x20] sm:$0xff] %vm103_vm0, %v158_v49 }
  0xc6   :  { %v289_v50 = vld [vmem:[#allocation2 + $0x20] sm:$0xff] }
 0x12f   :  { %v229_v31 = vpop.f32.mrf.mxu2 }
 0x130   :  { %v232_v32 = vadd.f32 %v229_v31, %v208_v30 }
 0x132   :  { %483 = vtanh.f32 %v232_v32 }
 0x138   :  { %v484_v33 = vpop.eup %483 }
 0x139   :  { %456 = vmatmul.msk.f32.vlgmr.msra.gmra.mxu3 %vm103_vm0, %v484_v33 }
 0x13a   :  { %419 = vmatpush.msra.mxu3 %v399_v62 }
 0x13c   :  { %420 = vmatpush.msra.mxu3 %v398_v63 }
 0x13e   :  { %421 = vmatpush.msra.mxu3 %v397_v0 }
 0x140   :  { %422 = vmatpush.msra.mxu3 %v396_v1 }
 0x1bc   :  { %v256_v38 = vpop.f32.mrf.mxu3 }
 0x1bd   :  { %v259_v39 = vadd.f32 %v256_v38, %v235_v37 }
 0x1bf   :  { %485 = vtanh.f32 %v259_v39 }
 0x1c5   :  { %v486_v40 = vpop.eup %485 }
 0x1c6   :  { %457 = vmatmul.msk.f32.vlgmr.msra.gmra.mxu1 %vm103_vm0, %v486_v40 }
 0x243   :  { %v283_v45 = vpop.f32.mrf.mxu1 }
 0x244   :  { %v286_v46 = vadd.f32 %v283_v45, %v262_v44 }
 0x246   :  { %487 = vtanh.f32 %v286_v46 }
 0x24c   :  { %v488_v47 = vpop.eup %487 }
 0x24d   :  { %458 = vmatmul.msk.f32.vlgmr.msra.gmra.mxu2 %vm103_vm0, %v488_v47 }
 0x2d0   :  { %v310_v51 = vpop.f32.mrf.mxu2 }
 0x2d1   :  { %v313_v52 = vadd.f32 %v310_v51, %v289_v50 }
 0x2d3   :  { %489 = vtanh.f32 %v313_v52 }
 0x2d9   :  { %v490_v53 = vpop.eup %489 }
 0x2da   :  { %459 = vmatmul.msk.f32.vlgmr.msrb.gmra.mxu3 %vm103_vm0, %v490_v53 }
 0x35d   :  { %v337_v55 = vpop.f32.mrf.mxu3 }
 0x35e   :  { %v340_v56 = vadd.f32 %v337_v55, %v316_v54 }
 0x360   :  { %491 = vtanh.f32 %v340_v56 }
 0x366   :  { %v492_v57 = vpop.eup %491 }
 0x367   :  { %460 = vmatmul.msk.f32.vlgmr.msrb.gmra.mxu1 %vm103_vm0, %v492_v57 }
 0x3e4   :  { %v364_v59 = vpop.f32.mrf.mxu1 }
 0x3e5   :  { %v367_v60 = vadd.f32 %v364_v59, %v343_v58 }
 0x3e7   :  { %493 = vtanh.f32 %v367_v60 }
 0x3ed   :  { %v494_v61 = vpop.eup %493 }
 0x3ee   :  { %461 = vmatmul.msk.f32.vlgmr.msrb.gmra.mxu2 %vm103_vm0, %v494_v61 }
 0x471   :  { %v391_v3 = vpop.f32.mrf.mxu2 }
 0x472   :  { %v394_v4 = vadd.f32 %v391_v3, %v370_v2 }
 0x474   :  { %495 = vtanh.f32 %v394_v4 }
 0x47a   :  { %v496_v5 = vpop.eup %495 }
 0x47b   :  { %462 = vmatmul.msk.f32.vlgmr.msra.gmra.mxu3 %vm103_vm0, %v496_v5 }
 0x4fe   :  { %v424_v7 = vpop.f32.mrf.mxu3 }
 0x4ff   :  { %v425_v8 = vadd.f32 %v480_v6, %v424_v7 }
 0x501   :  { %427 = vst [vmem:[#allocation11] sm:$0xff] %v425_v8 }
 0x502   :  { %438 = dma.vmem_to_hbm [thread:$0]  %s434_s19, 128, %s436_s22, [#allocation5]  }
 0x503   :  { %623 = dma.done.wait [#allocation5], 128  }
 0x504   :  { %624 = vsyncadd [#allocation5], 4294967168 }
 0x505   :  { %443 = vsyncpa [#allocation4], 1 }
 0x506   :  { %444 = vsyncpa [#allocation7], 1 }
 0x507   :  { %445 = vsyncpa [#allocation10], 1 }
 0x508   :  { %446 = vsyncpa [#allocation5], 1 }

</bundles_post_ra>
